<compile_context>
chip_gen: v7x
topology: tpu7x:2x2x1
jax: 0.10.0
libtpu: 0.0.40
codegen_flags: <defaults>
</compile_context>

<pallas_src>
import functools

import jax
import jax.numpy as jnp
from jax.experimental import pallas as pl
from jax.experimental.pallas import tpu as pltpu

LANE = 128


def _round_up(n, m):
    return ((n + m - 1) // m) * m


# ----------------------------- Pallas kernel -------------------------------
def densenet_fcn_kernel(x_ref,
                        w1_ref, b1_ref,
                        w2a_ref, w2b_ref, b2_ref,
                        w3a_ref, w3b_ref, w3c_ref, b3_ref,
                        w4_ref, b4_ref,
                        out_ref,
                        *, slope):
    """Fused forward pass for one batch tile.

    layer1: x1  = LeakyReLU(x @ W1 + b1)
    layer2: x2  = LeakyReLU([x, x1] @ W2 + b2)       == x@W2a + x1@W2b + b2
    layer3: x3  = LeakyReLU([x, x1, x2] @ W3 + b3)   == x@W3a + x1@W3b + x2@W3c + b3
    layer4: out = x3 @ W4 + b4
    All dots: bf16 operands, f32 accumulation; elementwise math in f32.
    """
    def leaky(z):
        # slope in (0, 1) => max(z, slope*z) == LeakyReLU(z); pure VPU, f32.
        return jnp.maximum(z, slope * z)

    x = x_ref[...]                                             # (tb, in_p) bf16

    # layer 1
    z1 = jnp.dot(x, w1_ref[...], preferred_element_type=jnp.float32) + b1_ref[...]
    x1 = leaky(z1).astype(jnp.bfloat16)

    # layer 2 : cat(x, x1) @ W2  ->  split-K accumulate in f32
    z2 = (jnp.dot(x,  w2a_ref[...], preferred_element_type=jnp.float32)
          + jnp.dot(x1, w2b_ref[...], preferred_element_type=jnp.float32)
          + b2_ref[...])
    x2 = leaky(z2).astype(jnp.bfloat16)

    # layer 3 : cat(x, x1, x2) @ W3
    z3 = (jnp.dot(x,  w3a_ref[...], preferred_element_type=jnp.float32)
          + jnp.dot(x1, w3b_ref[...], preferred_element_type=jnp.float32)
          + jnp.dot(x2, w3c_ref[...], preferred_element_type=jnp.float32)
          + b3_ref[...])
    x3 = leaky(z3).astype(jnp.bfloat16)

    # layer 4 : plain weight-normed Linear (no activation, no dropout)
    out = jnp.dot(x3, w4_ref[...], preferred_element_type=jnp.float32) + b4_ref[...]
    out_ref[...] = out.astype(out_ref.dtype)                   # lane-dense store


# ------------------------------ JAX wrapper ---------------------------------
def densenet_fcn_forward(x, kparams, *, slope, out_features, tile_b=None):
    """x: (B, in_features) float32. kparams: padded/split bf16 weights, f32 biases."""
    B, in_f = x.shape
    in_p = kparams["w1"].shape[0]
    out_p = kparams["w4"].shape[1]

    if tile_b is None:
        # One big tile for small batches; cap at 512 rows for large batches
        # (sweep 256-1024 in production), keep the batch axis "parallel".
        tile_b = min(_round_up(B, 8), 512)
    tile_b = _round_up(tile_b, 8)
    B_pad = _round_up(B, tile_b)

    # Pad batch rows + input features with zeros; cast activations to bf16.
    x_p = jnp.zeros((B_pad, in_p), jnp.bfloat16).at[:B, :in_f].set(
        x.astype(jnp.bfloat16))

    w1, b1 = kparams["w1"], kparams["b1"]
    w2a, w2b, b2 = kparams["w2a"], kparams["w2b"], kparams["b2"]
    w3a, w3b, w3c, b3 = kparams["w3a"], kparams["w3b"], kparams["w3c"], kparams["b3"]
    w4, b4 = kparams["w4"], kparams["b4"]

    full = lambda i: (0, 0)        # grid-invariant weight / bias blocks
    row = lambda i: (i, 0)         # activations tiled over batch

    def wspec(a):
        return pl.BlockSpec(a.shape, full)

    out_full = pl.pallas_call(
        functools.partial(densenet_fcn_kernel, slope=slope),
        out_shape=jax.ShapeDtypeStruct((B_pad, out_p), jnp.float32),
        grid=(B_pad // tile_b,),
        in_specs=[pl.BlockSpec((tile_b, in_p), row)]
        + [wspec(a) for a in (w1, b1, w2a, w2b, b2, w3a, w3b, w3c, b3, w4, b4)],
        out_specs=pl.BlockSpec((tile_b, out_p), row),
        compiler_params=pltpu.CompilerParams(
            dimension_semantics=("parallel",)),
    )(x_p, w1, b1, w2a, w2b, b2, w3a, w3b, w3c, b3, w4, b4)

    return out_full[:B, :out_features]


# --------------------------- parameter helpers ------------------------------
def weight_norm_effective(w):
    """WeightNorm reparam at init: g=||w||, v=w/g, w_eff = v * g/||v|| (identity).
    NOTE: matches the module's whole-tensor-norm WeightNorm only at init; a
    separately-trained g is not modeled here."""
    g = jnp.sqrt(jnp.sum(w * w))
    v = w / g
    return v * (g / jnp.sqrt(jnp.sum(v * v)))


def init_linear(key, in_f, out_f):
    """PyTorch-style Linear init (uniform +-1/sqrt(fan_in)), deterministic."""
    kw, kb = jax.random.split(key)
    bound = 1.0 / jnp.sqrt(jnp.float32(in_f))
    w = jax.random.uniform(kw, (out_f, in_f), jnp.float32, -bound, bound)  # torch layout
    b = jax.random.uniform(kb, (out_f,), jnp.float32, -bound, bound)
    w_eff = weight_norm_effective(w)
    # transpose to (in, out) for lane-dense MXU matmul, bias to (1, out)
    return w_eff.T, b.reshape(1, out_f)


def make_reference_params(key, in_features, hidden_features, out_features):
    k1, k2, k3, k4 = jax.random.split(key, 4)
    h0, h1, h2 = hidden_features
    w1, b1 = init_linear(k1, in_features, h0)
    w2, b2 = init_linear(k2, in_features + h0, h1)
    w3, b3 = init_linear(k3, in_features + h0 + h1, h2)
    w4, b4 = init_linear(k4, h2, out_features)
    return dict(w1=w1, b1=b1, w2=w2, b2=b2, w3=w3, b3=b3, w4=w4, b4=b4)


def _pad2(a, rows, cols, dtype):
    out = jnp.zeros((rows, cols), dtype)
    return out.at[: a.shape[0], : a.shape[1]].set(a.astype(dtype))


def prepare_kernel_params(ref, in_features, hidden_features, out_features, lane=LANE):
    """Zero-pad all feature dims to `lane`, split w2/w3 at the concat boundaries,
    cast weights to bf16 (biases stay f32)."""
    h0, h1, h2 = hidden_features
    in_p = _round_up(in_features, lane)
    h0_p = _round_up(h0, lane)
    h1_p = _round_up(h1, lane)
    h2_p = _round_up(h2, lane)
    out_p = _round_up(out_features, lane)

    w2, w3 = ref["w2"], ref["w3"]
    return dict(
        w1=_pad2(ref["w1"], in_p, h0_p, jnp.bfloat16),
        b1=_pad2(ref["b1"], 1, h0_p, jnp.float32),
        w2a=_pad2(w2[:in_features, :], in_p, h1_p, jnp.bfloat16),
        w2b=_pad2(w2[in_features:in_features + h0, :], h0_p, h1_p, jnp.bfloat16),
        b2=_pad2(ref["b2"], 1, h1_p, jnp.float32),
        w3a=_pad2(w3[:in_features, :], in_p, h2_p, jnp.bfloat16),
        w3b=_pad2(w3[in_features:in_features + h0, :], h0_p, h2_p, jnp.bfloat16),
        w3c=_pad2(w3[in_features + h0:in_features + h0 + h1, :], h1_p, h2_p,
                  jnp.bfloat16),
        b3=_pad2(ref["b3"], 1, h2_p, jnp.float32),
        w4=_pad2(ref["w4"], h2_p, out_p, jnp.bfloat16),
        b4=_pad2(ref["b4"], 1, out_p, jnp.float32),
    )


# ------------------------------ references -----------------------------------
def reference_forward_f32(x, p, slope):
    leaky = lambda z: jnp.maximum(z, slope * z)
    x1 = leaky(x @ p["w1"] + p["b1"])
    xc = jnp.concatenate((x, x1), axis=1)
    x2 = leaky(xc @ p["w2"] + p["b2"])
    xc = jnp.concatenate((xc, x2), axis=1)
    x3 = leaky(xc @ p["w3"] + p["b3"])
    return x3 @ p["w4"] + p["b4"]


def reference_forward_bf16(x, p, slope):
    """Precision-matched reference: bf16 matmul operands, f32 accumulation."""
    leaky = lambda z: jnp.maximum(z, slope * z)

    def lin(a, w, b):
        return jnp.dot(a.astype(jnp.bfloat16), w.astype(jnp.bfloat16),
                       preferred_element_type=jnp.float32) + b

    x1 = leaky(lin(x, p["w1"], p["b1"]))
    xc = jnp.concatenate((x, x1), axis=1)
    x2 = leaky(lin(xc, p["w2"], p["b2"]))
    xc = jnp.concatenate((xc, x2), axis=1)
    x3 = leaky(lin(xc, p["w3"], p["b3"]))
    return lin(x3, p["w4"], p["b4"])


# --------------------------------- main --------------------------------------
if __name__ == "__main__":
    in_features = 16
    hidden_features = [32, 32, 32]
    out_features = 8
    leaky_relu_slope = 0.2
    batch = 16

    key = jax.random.PRNGKey(0)
    kx, kp = jax.random.split(key)
    x = jax.random.normal(kx, (batch, in_features), jnp.float32)

    ref_params = make_reference_params(kp, in_features, hidden_features, out_features)
    kernel_params = prepare_kernel_params(ref_params, in_features, hidden_features,
                                          out_features)

    out = densenet_fcn_forward(x, kernel_params, slope=leaky_relu_slope,
                               out_features=out_features)
    out = jax.block_until_ready(out)
    assert out.shape == (batch, out_features)

    # Precision-matched (bf16 matmul / f32 accumulate) reference: tight check.
    matched = reference_forward_bf16(x, ref_params, leaky_relu_slope)
    assert jnp.allclose(out, matched, atol=2e-3, rtol=2e-3), \
        "mismatch vs bf16-matched reference"

    # Full-f32 reference: loose check that the overall math is faithful.
    full = reference_forward_f32(x, ref_params, leaky_relu_slope)
    assert jnp.allclose(out, full, atol=5e-2, rtol=5e-2), "mismatch vs f32 reference"

    print("KERNEL_OK")
</pallas_src>

<mosaic_0001>
module attributes {stable_mosaic.version = 11 : i64} {
  func.func @densenet_fcn_kernel(%arg0: i32, %arg1: memref<16x128xbf16, #tpu.memory_space<vmem>>, %arg2: memref<128x128xbf16, #tpu.memory_space<vmem>>, %arg3: memref<1x128xf32, #tpu.memory_space<vmem>>, %arg4: memref<128x128xbf16, #tpu.memory_space<vmem>>, %arg5: memref<128x128xbf16, #tpu.memory_space<vmem>>, %arg6: memref<1x128xf32, #tpu.memory_space<vmem>>, %arg7: memref<128x128xbf16, #tpu.memory_space<vmem>>, %arg8: memref<128x128xbf16, #tpu.memory_space<vmem>>, %arg9: memref<128x128xbf16, #tpu.memory_space<vmem>>, %arg10: memref<1x128xf32, #tpu.memory_space<vmem>>, %arg11: memref<128x128xbf16, #tpu.memory_space<vmem>>, %arg12: memref<1x128xf32, #tpu.memory_space<vmem>>, %arg13: memref<16x128xf32, #tpu.memory_space<vmem>>) attributes {dimension_semantics = [#tpu.dimension_semantics<parallel>], iteration_bounds = array<i64: 1>, scalar_prefetch = 0 : i64, scratch_operands = 0 : i64, tpu.core_type = #tpu.core_type<tc>, window_params = [{transform_indices = @transform_0, window_bounds = array<i64: 16, 128>}, {pipeline_mode = #tpu.pipeline_mode<synchronous>, transform_indices = @transform_1, window_bounds = array<i64: 128, 128>}, {pipeline_mode = #tpu.pipeline_mode<synchronous>, transform_indices = @transform_2, window_bounds = array<i64: 1, 128>}, {pipeline_mode = #tpu.pipeline_mode<synchronous>, transform_indices = @transform_3, window_bounds = array<i64: 128, 128>}, {pipeline_mode = #tpu.pipeline_mode<synchronous>, transform_indices = @transform_4, window_bounds = array<i64: 128, 128>}, {pipeline_mode = #tpu.pipeline_mode<synchronous>, transform_indices = @transform_5, window_bounds = array<i64: 1, 128>}, {pipeline_mode = #tpu.pipeline_mode<synchronous>, transform_indices = @transform_6, window_bounds = array<i64: 128, 128>}, {pipeline_mode = #tpu.pipeline_mode<synchronous>, transform_indices = @transform_7, window_bounds = array<i64: 128, 128>}, {pipeline_mode = #tpu.pipeline_mode<synchronous>, transform_indices = @transform_8, window_bounds = array<i64: 128, 128>}, {pipeline_mode = #tpu.pipeline_mode<synchronous>, transform_indices = @transform_9, window_bounds = array<i64: 1, 128>}, {pipeline_mode = #tpu.pipeline_mode<synchronous>, transform_indices = @transform_10, window_bounds = array<i64: 128, 128>}, {pipeline_mode = #tpu.pipeline_mode<synchronous>, transform_indices = @transform_11, window_bounds = array<i64: 1, 128>}, {transform_indices = @transform_12, window_bounds = array<i64: 16, 128>}]} {
    %c0 = arith.constant 0 : index
    %c0_0 = arith.constant 0 : index
    %0 = vector.load %arg1[%c0, %c0_0] : memref<16x128xbf16, #tpu.memory_space<vmem>>, vector<16x128xbf16>
    %c0_1 = arith.constant 0 : index
    %c0_2 = arith.constant 0 : index
    %1 = vector.load %arg2[%c0_1, %c0_2] : memref<128x128xbf16, #tpu.memory_space<vmem>>, vector<128x128xbf16>
    %cst = arith.constant dense<0.000000e+00> : vector<16x128xf32>
    %2 = tpu.matmul %0, %1, %cst {dimension_numbers = #tpu.dot_dimension_numbers<[1], [0], [0], [1], [0, 0, 1, 1], [], []>} : vector<16x128xbf16>, vector<128x128xbf16>, vector<16x128xf32> -> vector<16x128xf32>
    %c0_3 = arith.constant 0 : index
    %c0_4 = arith.constant 0 : index
    %3 = vector.load %arg3[%c0_3, %c0_4] : memref<1x128xf32, #tpu.memory_space<vmem>>, vector<1x128xf32>
    %4 = vector.broadcast %3 : vector<1x128xf32> to vector<16x128xf32>
    %5 = arith.addf %2, %4 : vector<16x128xf32>
    %cst_5 = arith.constant 2.000000e-01 : f32
    %6 = vector.broadcast %cst_5 : f32 to vector<16x128xf32>
    %7 = arith.mulf %6, %5 : vector<16x128xf32>
    %8 = arith.maximumf %5, %7 : vector<16x128xf32>
    %9 = arith.truncf %8 : vector<16x128xf32> to vector<16x128xbf16>
    %c0_6 = arith.constant 0 : index
    %c0_7 = arith.constant 0 : index
    %10 = vector.load %arg4[%c0_6, %c0_7] : memref<128x128xbf16, #tpu.memory_space<vmem>>, vector<128x128xbf16>
    %cst_8 = arith.constant dense<0.000000e+00> : vector<16x128xf32>
    %11 = tpu.matmul %0, %10, %cst_8 {dimension_numbers = #tpu.dot_dimension_numbers<[1], [0], [0], [1], [0, 0, 1, 1], [], []>} : vector<16x128xbf16>, vector<128x128xbf16>, vector<16x128xf32> -> vector<16x128xf32>
    %c0_9 = arith.constant 0 : index
    %c0_10 = arith.constant 0 : index
    %12 = vector.load %arg5[%c0_9, %c0_10] : memref<128x128xbf16, #tpu.memory_space<vmem>>, vector<128x128xbf16>
    %cst_11 = arith.constant dense<0.000000e+00> : vector<16x128xf32>
    %13 = tpu.matmul %9, %12, %cst_11 {dimension_numbers = #tpu.dot_dimension_numbers<[1], [0], [0], [1], [0, 0, 1, 1], [], []>} : vector<16x128xbf16>, vector<128x128xbf16>, vector<16x128xf32> -> vector<16x128xf32>
    %14 = arith.addf %11, %13 : vector<16x128xf32>
    %c0_12 = arith.constant 0 : index
    %c0_13 = arith.constant 0 : index
    %15 = vector.load %arg6[%c0_12, %c0_13] : memref<1x128xf32, #tpu.memory_space<vmem>>, vector<1x128xf32>
    %16 = vector.broadcast %15 : vector<1x128xf32> to vector<16x128xf32>
    %17 = arith.addf %14, %16 : vector<16x128xf32>
    %cst_14 = arith.constant 2.000000e-01 : f32
    %18 = vector.broadcast %cst_14 : f32 to vector<16x128xf32>
    %19 = arith.mulf %18, %17 : vector<16x128xf32>
    %20 = arith.maximumf %17, %19 : vector<16x128xf32>
    %21 = arith.truncf %20 : vector<16x128xf32> to vector<16x128xbf16>
    %c0_15 = arith.constant 0 : index
    %c0_16 = arith.constant 0 : index
    %22 = vector.load %arg7[%c0_15, %c0_16] : memref<128x128xbf16, #tpu.memory_space<vmem>>, vector<128x128xbf16>
    %cst_17 = arith.constant dense<0.000000e+00> : vector<16x128xf32>
    %23 = tpu.matmul %0, %22, %cst_17 {dimension_numbers = #tpu.dot_dimension_numbers<[1], [0], [0], [1], [0, 0, 1, 1], [], []>} : vector<16x128xbf16>, vector<128x128xbf16>, vector<16x128xf32> -> vector<16x128xf32>
    %c0_18 = arith.constant 0 : index
    %c0_19 = arith.constant 0 : index
    %24 = vector.load %arg8[%c0_18, %c0_19] : memref<128x128xbf16, #tpu.memory_space<vmem>>, vector<128x128xbf16>
    %cst_20 = arith.constant dense<0.000000e+00> : vector<16x128xf32>
    %25 = tpu.matmul %9, %24, %cst_20 {dimension_numbers = #tpu.dot_dimension_numbers<[1], [0], [0], [1], [0, 0, 1, 1], [], []>} : vector<16x128xbf16>, vector<128x128xbf16>, vector<16x128xf32> -> vector<16x128xf32>
    %26 = arith.addf %23, %25 : vector<16x128xf32>
    %c0_21 = arith.constant 0 : index
    %c0_22 = arith.constant 0 : index
    %27 = vector.load %arg9[%c0_21, %c0_22] : memref<128x128xbf16, #tpu.memory_space<vmem>>, vector<128x128xbf16>
    %cst_23 = arith.constant dense<0.000000e+00> : vector<16x128xf32>
    %28 = tpu.matmul %21, %27, %cst_23 {dimension_numbers = #tpu.dot_dimension_numbers<[1], [0], [0], [1], [0, 0, 1, 1], [], []>} : vector<16x128xbf16>, vector<128x128xbf16>, vector<16x128xf32> -> vector<16x128xf32>
    %29 = arith.addf %26, %28 : vector<16x128xf32>
    %c0_24 = arith.constant 0 : index
    %c0_25 = arith.constant 0 : index
    %30 = vector.load %arg10[%c0_24, %c0_25] : memref<1x128xf32, #tpu.memory_space<vmem>>, vector<1x128xf32>
    %31 = vector.broadcast %30 : vector<1x128xf32> to vector<16x128xf32>
    %32 = arith.addf %29, %31 : vector<16x128xf32>
    %cst_26 = arith.constant 2.000000e-01 : f32
    %33 = vector.broadcast %cst_26 : f32 to vector<16x128xf32>
    %34 = arith.mulf %33, %32 : vector<16x128xf32>
    %35 = arith.maximumf %32, %34 : vector<16x128xf32>
    %36 = arith.truncf %35 : vector<16x128xf32> to vector<16x128xbf16>
    %c0_27 = arith.constant 0 : index
    %c0_28 = arith.constant 0 : index
    %37 = vector.load %arg11[%c0_27, %c0_28] : memref<128x128xbf16, #tpu.memory_space<vmem>>, vector<128x128xbf16>
    %cst_29 = arith.constant dense<0.000000e+00> : vector<16x128xf32>
    %38 = tpu.matmul %36, %37, %cst_29 {dimension_numbers = #tpu.dot_dimension_numbers<[1], [0], [0], [1], [0, 0, 1, 1], [], []>} : vector<16x128xbf16>, vector<128x128xbf16>, vector<16x128xf32> -> vector<16x128xf32>
    %c0_30 = arith.constant 0 : index
    %c0_31 = arith.constant 0 : index
    %39 = vector.load %arg12[%c0_30, %c0_31] : memref<1x128xf32, #tpu.memory_space<vmem>>, vector<1x128xf32>
    %40 = vector.broadcast %39 : vector<1x128xf32> to vector<16x128xf32>
    %41 = arith.addf %38, %40 : vector<16x128xf32>
    %c0_32 = arith.constant 0 : index
    %c0_33 = arith.constant 0 : index
    %42 = vector.load %arg13[%c0_32, %c0_33] : memref<16x128xf32, #tpu.memory_space<vmem>>, vector<16x128xf32>
    tpu.vector_store %arg13[%c0_32, %c0_33], %41 {strides = array<i32>} : memref<16x128xf32, #tpu.memory_space<vmem>>, vector<16x128xf32>,
    return
  }
  func.func @transform_0(%arg0: i32) -> (i32, i32) {
    %c0_i32 = arith.constant 0 : i32
    %c0_i32_0 = arith.constant 0 : i32
    return %arg0, %c0_i32 : i32, i32
  }
  func.func @transform_1(%arg0: i32) -> (i32, i32) {
    %c0_i32 = arith.constant 0 : i32
    %c0_i32_0 = arith.constant 0 : i32
    %c0_i32_1 = arith.constant 0 : i32
    return %c0_i32, %c0_i32_0 : i32, i32
  }
  func.func @transform_2(%arg0: i32) -> (i32, i32) {
    %c0_i32 = arith.constant 0 : i32
    %c0_i32_0 = arith.constant 0 : i32
    %c0_i32_1 = arith.constant 0 : i32
    return %c0_i32, %c0_i32_0 : i32, i32
  }
  func.func @transform_3(%arg0: i32) -> (i32, i32) {
    %c0_i32 = arith.constant 0 : i32
    %c0_i32_0 = arith.constant 0 : i32
    %c0_i32_1 = arith.constant 0 : i32
    return %c0_i32, %c0_i32_0 : i32, i32
  }
  func.func @transform_4(%arg0: i32) -> (i32, i32) {
    %c0_i32 = arith.constant 0 : i32
    %c0_i32_0 = arith.constant 0 : i32
    %c0_i32_1 = arith.constant 0 : i32
    return %c0_i32, %c0_i32_0 : i32, i32
  }
  func.func @transform_5(%arg0: i32) -> (i32, i32) {
    %c0_i32 = arith.constant 0 : i32
    %c0_i32_0 = arith.constant 0 : i32
    %c0_i32_1 = arith.constant 0 : i32
    return %c0_i32, %c0_i32_0 : i32, i32
  }
  func.func @transform_6(%arg0: i32) -> (i32, i32) {
    %c0_i32 = arith.constant 0 : i32
    %c0_i32_0 = arith.constant 0 : i32
    %c0_i32_1 = arith.constant 0 : i32
    return %c0_i32, %c0_i32_0 : i32, i32
  }
  func.func @transform_7(%arg0: i32) -> (i32, i32) {
    %c0_i32 = arith.constant 0 : i32
    %c0_i32_0 = arith.constant 0 : i32
    %c0_i32_1 = arith.constant 0 : i32
    return %c0_i32, %c0_i32_0 : i32, i32
  }
  func.func @transform_8(%arg0: i32) -> (i32, i32) {
    %c0_i32 = arith.constant 0 : i32
    %c0_i32_0 = arith.constant 0 : i32
    %c0_i32_1 = arith.constant 0 : i32
    return %c0_i32, %c0_i32_0 : i32, i32
  }
  func.func @transform_9(%arg0: i32) -> (i32, i32) {
    %c0_i32 = arith.constant 0 : i32
    %c0_i32_0 = arith.constant 0 : i32
    %c0_i32_1 = arith.constant 0 : i32
    return %c0_i32, %c0_i32_0 : i32, i32
  }
  func.func @transform_10(%arg0: i32) -> (i32, i32) {
    %c0_i32 = arith.constant 0 : i32
    %c0_i32_0 = arith.constant 0 : i32
    %c0_i32_1 = arith.constant 0 : i32
    return %c0_i32, %c0_i32_0 : i32, i32
  }
  func.func @transform_11(%arg0: i32) -> (i32, i32) {
    %c0_i32 = arith.constant 0 : i32
    %c0_i32_0 = arith.constant 0 : i32
    %c0_i32_1 = arith.constant 0 : i32
    return %c0_i32, %c0_i32_0 : i32, i32
  }
  func.func @transform_12(%arg0: i32) -> (i32, i32) {
    %c0_i32 = arith.constant 0 : i32
    %c0_i32_0 = arith.constant 0 : i32
    return %arg0, %c0_i32 : i32, i32
  }
}

</mosaic_0001>

<bundles_post_ra>
// kernel: tpu_custom_call.1
= control target key start
LH: loop header
LB: loop body
LE: loop exit
PB: predicated region body
PF: predicated region fallthrough
CT: control target
= control target key end

     0   :  { %17 = vsyncpa [#allocation3], 0  ;;  %s1840_s0 = inlined_call_operand.hbm [shape: bf16[16,128], index: 0, kind: input, shape index: {}]   ;;  %s1841_s1 = inlined_call_operand.hbm [shape: bf16[128,128], index: 1, kind: input, shape index: {}]   ;;  %s1842_s2 = inlined_call_operand.vmem [shape: f32[1,128], index: 2, kind: input, shape index: {}]   ;;  %s1843_s3 = inlined_call_operand.hbm [shape: bf16[128,128], index: 3, kind: input, shape index: {}]   ;;  %s1844_s4 = inlined_call_operand.hbm [shape: bf16[128,128], index: 4, kind: input, shape index: {}]   ;;  %s1845_s5 = inlined_call_operand.vmem [shape: f32[1,128], index: 5, kind: input, shape index: {}]   ;;  %s1846_s6 = inlined_call_operand.hbm [shape: bf16[128,128], index: 6, kind: input, shape index: {}]   ;;  %s1847_s7 = inlined_call_operand.hbm [shape: bf16[128,128], index: 7, kind: input, shape index: {}]   ;;  %s1848_s8 = inlined_call_operand.hbm [shape: bf16[128,128], index: 8, kind: input, shape index: {}]   ;;  %s1849_s9 = inlined_call_operand.vmem [shape: f32[1,128], index: 9, kind: input, shape index: {}]   ;;  %s1850_s10 = inlined_call_operand.hbm [shape: bf16[128,128], index: 10, kind: input, shape index: {}]   ;;  %s1851_s11 = inlined_call_operand.vmem [shape: f32[1,128], index: 11, kind: input, shape index: {}]   ;;  %s1852_s12 = inlined_call_operand.hbm [shape: f32[16,128], index: 12, kind: output, shape index: {}]  }
   0x1   :  { %18 = vsyncpa [#allocation6], 0 }
   0x2   :  { %19 = vsyncpa [#allocation9], 0 }
   0x3   :  { %20 = vsyncpa [#allocation12], 0 }
   0x4   :  { %21 = vsyncpa [#allocation15], 0 }
   0x5   :  { %22 = vsyncpa [#allocation4], 0  ;;  %s1513_s21 = smov [#allocation5]   ;;  %s1514_s23 = smov [#allocation8]  }
   0x6   :  { %s40_s22 = sshll.u32 %s1513_s21, 4  ;;  %s66_s24 = sshll.u32 %s1514_s23, 4  ;;  %s41_s22 = int_to_ptr.vmem [resolvable:$true] %s40_s22  ;;  %s1593_s24 = int_to_ptr.vmem [resolvable:$true] %s66_s24 }
   0x7   :  { %s1303_s27 = scalar_lea.hbm %s1841_s1, 1024 }
   0x8   :  { %p1304_p0 = scmp.ne.s32.totalorder %s1841_s1, %s1303_s27  ;;  %p1307_p1 = scmp.lt.u32.totalorder %s1303_s27, %s1841_s1 }
   0xa   :  { %p1309_p2 = pnand %p1307_p1, %p1304_p0 }
   0xc   :  { %1312 = shalt.err (!%p1309_p2)
}
   0xd   :  { %s1313_s14 = scalar_lea.vmem %s41_s22, 1024  ;;  %p1318_p4 = scmp.lt.s32.totalorder %s41_s22, %s41_s22 }
   0xe   :  { %p1314_p3 = scmp.ne.s32.totalorder %s41_s22, %s1313_s14  ;;  %p1319_p5 = scmp.lt.s32.totalorder %s1313_s14, %s1313_s14 }
  0x10   :  { %p1320_p6 = por %p1319_p5, %p1318_p4 }
  0x12   :  { %p1321_p7 = pnand %p1320_p6, %p1314_p3 }
  0x14   :  { %1324 = shalt.err (!%p1321_p7)
}
  0x15   :  { %s1515_s15 = smov 64   ;;  %s1516_s16 = smov 4  }
  0x16   :  { %46 = dma.hbm_to_vmem [thread:$0]  %s1841_s1, 1024, %s41_s22, [#allocation6], %s1515_s15, %s1515_s15, %s1516_s16  }
  0x17   :  { %s1325_s21 = scalar_lea.hbm %s1844_s4, 1024 }
  0x18   :  { %p1326_p8 = scmp.ne.s32.totalorder %s1844_s4, %s1325_s21  ;;  %p1329_p9 = scmp.lt.u32.totalorder %s1325_s21, %s1844_s4 }
  0x1a   :  { %p1331_p10 = pnand %p1329_p9, %p1326_p8 }
  0x1c   :  { %1334 = shalt.err (!%p1331_p10)
}
  0x1d   :  { %s1335_s28 = scalar_lea.vmem %s1593_s24, 1024  ;;  %p1340_p12 = scmp.lt.s32.totalorder %s1593_s24, %s1593_s24 }
  0x1e   :  { %p1336_p11 = scmp.ne.s32.totalorder %s1593_s24, %s1335_s28  ;;  %p1341_p13 = scmp.lt.s32.totalorder %s1335_s28, %s1335_s28 }
  0x20   :  { %p1342_p0 = por %p1341_p13, %p1340_p12 }
  0x22   :  { %p1343_p1 = pnand %p1342_p0, %p1336_p11 }
  0x24   :  { %1346 = shalt.err (!%p1343_p1)
}
  0x25   :  { %72 = dma.hbm_to_vmem [thread:$0]  %s1844_s4, 1024, %s1593_s24, [#allocation9], %s1515_s15, %s1515_s15, %s1516_s16  }
  0x26   :  { %s1517_s29 = smov [#allocation11]   ;;  %s1518_s13 = smov [#allocation2]  }
  0x27   :  { %s92_s30 = sshll.u32 %s1517_s29, 4  ;;  %s28_s14 = sshll.u32 %s1518_s13, 4  ;;  %s93_s30 = int_to_ptr.vmem [resolvable:$true] %s92_s30  ;;  %s1630_s14 = int_to_ptr.vmem [resolvable:$true] %s28_s14 }
  0x28   :  { %s1347_s19 = scalar_lea.hbm %s1847_s7, 1024 }
  0x29   :  { %p1348_p2 = scmp.ne.s32.totalorder %s1847_s7, %s1347_s19  ;;  %p1351_p3 = scmp.lt.u32.totalorder %s1347_s19, %s1847_s7 }
  0x2b   :  { %p1353_p4 = pnand %p1351_p3, %p1348_p2 }
  0x2d   :  { %1356 = shalt.err (!%p1353_p4)
}
  0x2e   :  { %s1357_s4 = scalar_lea.vmem %s93_s30, 1024  ;;  %p1362_p6 = scmp.lt.s32.totalorder %s93_s30, %s93_s30 }
  0x2f   :  { %p1358_p5 = scmp.ne.s32.totalorder %s93_s30, %s1357_s4  ;;  %p1363_p7 = scmp.lt.s32.totalorder %s1357_s4, %s1357_s4 }
  0x31   :  { %p1364_p8 = por %p1363_p7, %p1362_p6 }
  0x33   :  { %p1365_p9 = pnand %p1364_p8, %p1358_p5 }
  0x35   :  { %1368 = shalt.err (!%p1365_p9)
}
  0x36   :  { %98 = dma.hbm_to_vmem [thread:$0]  %s1847_s7, 1024, %s93_s30, [#allocation12], %s1515_s15, %s1515_s15, %s1516_s16  }
  0x37   :  { %s1369_s1 = scalar_lea.hbm %s1840_s0, 128 }
  0x38   :  { %p1370_p10 = scmp.ne.s32.totalorder %s1840_s0, %s1369_s1  ;;  %p1373_p11 = scmp.lt.u32.totalorder %s1369_s1, %s1840_s0 }
  0x3a   :  { %p1375_p12 = pnand %p1373_p11, %p1370_p10 }
  0x3c   :  { %1378 = shalt.err (!%p1375_p12)
}
  0x3d   :  { %s1379_s18 = scalar_lea.vmem %s1630_s14, 128  ;;  %p1384_p0 = scmp.lt.s32.totalorder %s1630_s14, %s1630_s14 }
  0x3e   :  { %p1380_p13 = scmp.ne.s32.totalorder %s1630_s14, %s1379_s18  ;;  %p1385_p1 = scmp.lt.s32.totalorder %s1379_s18, %s1379_s18 }
  0x40   :  { %p1386_p2 = por %p1385_p1, %p1384_p0 }
  0x42   :  { %p1387_p3 = pnand %p1386_p2, %p1380_p13 }
  0x44   :  { %1390 = shalt.err (!%p1387_p3)
}
  0x45   :  { %34 = dma.hbm_to_vmem [thread:$0]  %s1840_s0, 128, %s1630_s14, [#allocation3], %s1515_s15, %s1515_s15, %s1516_s16  }
  0x46   :  { %s1519_s19 = smov [#allocation7]   ;;  %s1520_s21 = smov [#allocation10]  }
  0x47   :  { %s54_s20 = sshll.u32 %s1519_s19, 4  ;;  %s80_s23 = sshll.u32 %s1520_s21, 4  ;;  %s55_s20 = int_to_ptr.vmem [resolvable:$true] %s54_s20  ;;  %s1667_s23 = int_to_ptr.vmem [resolvable:$true] %s80_s23 }
  0x48   :  { %s1391_s24 = scalar_lea.hbm %s1843_s3, 1024 }
  0x49   :  { %p1392_p4 = scmp.ne.s32.totalorder %s1843_s3, %s1391_s24  ;;  %p1395_p5 = scmp.lt.u32.totalorder %s1391_s24, %s1843_s3 }
  0x4b   :  { %p1397_p6 = pnand %p1395_p5, %p1392_p4 }
  0x4d   :  { %1400 = shalt.err (!%p1397_p6)
}
  0x4e   :  { %s1401_s0 = scalar_lea.vmem %s55_s20, 1024  ;;  %p1406_p8 = scmp.lt.s32.totalorder %s55_s20, %s55_s20 }
  0x4f   :  { %p1402_p7 = scmp.ne.s32.totalorder %s55_s20, %s1401_s0  ;;  %p1407_p9 = scmp.lt.s32.totalorder %s1401_s0, %s1401_s0 }
  0x51   :  { %p1408_p10 = por %p1407_p9, %p1406_p8 }
  0x53   :  { %p1409_p11 = pnand %p1408_p10, %p1402_p7 }
  0x55   :  { %1412 = shalt.err (!%p1409_p11)
}
  0x56   :  { %60 = dma.hbm_to_vmem [thread:$0]  %s1843_s3, 1024, %s55_s20, [#allocation6], %s1515_s15, %s1515_s15, %s1516_s16  }
  0x57   :  { %s1413_s17 = scalar_lea.hbm %s1846_s6, 1024 }
  0x58   :  { %p1414_p12 = scmp.ne.s32.totalorder %s1846_s6, %s1413_s17  ;;  %p1417_p13 = scmp.lt.u32.totalorder %s1413_s17, %s1846_s6 }
  0x5a   :  { %p1419_p0 = pnand %p1417_p13, %p1414_p12 }
  0x5c   :  { %1422 = shalt.err (!%p1419_p0)
}
  0x5d   :  { %s1423_s21 = scalar_lea.vmem %s1667_s23, 1024  ;;  %p1428_p2 = scmp.lt.s32.totalorder %s1667_s23, %s1667_s23 }
  0x5e   :  { %p1424_p1 = scmp.ne.s32.totalorder %s1667_s23, %s1423_s21  ;;  %p1429_p3 = scmp.lt.s32.totalorder %s1423_s21, %s1423_s21 }
  0x60   :  { %p1430_p4 = por %p1429_p3, %p1428_p2 }
  0x62   :  { %p1431_p5 = pnand %p1430_p4, %p1424_p1 }
  0x64   :  { %1434 = shalt.err (!%p1431_p5)
}
  0x65   :  { %86 = dma.hbm_to_vmem [thread:$0]  %s1846_s6, 1024, %s1667_s23, [#allocation9], %s1515_s15, %s1515_s15, %s1516_s16  }
  0x66   :  { %s1521_s25 = smov [#allocation13]   ;;  %s1522_s24 = smov [#allocation14]  }
  0x67   :  { %s104_s4 = sshll.u32 %s1521_s25, 4  ;;  %s118_s26 = sshll.u32 %s1522_s24, 4  ;;  %s105_s4 = int_to_ptr.vmem [resolvable:$true] %s104_s4  ;;  %s1704_s26 = int_to_ptr.vmem [resolvable:$true] %s118_s26 }
  0x68   :  { %s1435_s1 = scalar_lea.hbm %s1848_s8, 1024 }
  0x69   :  { %p1436_p6 = scmp.ne.s32.totalorder %s1848_s8, %s1435_s1  ;;  %p1439_p7 = scmp.lt.u32.totalorder %s1435_s1, %s1848_s8 }
  0x6b   :  { %p1441_p8 = pnand %p1439_p7, %p1436_p6 }
  0x6d   :  { %1444 = shalt.err (!%p1441_p8)
}
  0x6e   :  { %s1445_s6 = scalar_lea.vmem %s105_s4, 1024  ;;  %p1450_p10 = scmp.lt.s32.totalorder %s105_s4, %s105_s4 }
  0x6f   :  { %p1446_p9 = scmp.ne.s32.totalorder %s105_s4, %s1445_s6  ;;  %p1451_p11 = scmp.lt.s32.totalorder %s1445_s6, %s1445_s6 }
  0x71   :  { %p1452_p12 = por %p1451_p11, %p1450_p10 }
  0x73   :  { %p1453_p13 = pnand %p1452_p12, %p1446_p9 }
  0x75   :  { %1456 = shalt.err (!%p1453_p13)
}
  0x76   :  { %110 = dma.hbm_to_vmem [thread:$0]  %s1848_s8, 1024, %s105_s4, [#allocation12], %s1515_s15, %s1515_s15, %s1516_s16  }
  0x77   :  { %s1457_s7 = scalar_lea.hbm %s1850_s10, 1024 }
  0x78   :  { %p1458_p0 = scmp.ne.s32.totalorder %s1850_s10, %s1457_s7  ;;  %p1461_p1 = scmp.lt.u32.totalorder %s1457_s7, %s1850_s10 }
  0x7a   :  { %p1463_p2 = pnand %p1461_p1, %p1458_p0 }
  0x7c   :  { %1466 = shalt.err (!%p1463_p2)
}
  0x7d   :  { %s1467_s20 = scalar_lea.vmem %s1704_s26, 1024  ;;  %p1472_p4 = scmp.lt.s32.totalorder %s1704_s26, %s1704_s26 }
  0x7e   :  { %p1468_p3 = scmp.ne.s32.totalorder %s1704_s26, %s1467_s20  ;;  %p1473_p5 = scmp.lt.s32.totalorder %s1467_s20, %s1467_s20 }
  0x80   :  { %p1474_p6 = por %p1473_p5, %p1472_p4 }
  0x82   :  { %p1475_p7 = pnand %p1474_p6, %p1468_p3 }
  0x84   :  { %1478 = shalt.err (!%p1475_p7)
}
  0x85   :  { %124 = dma.hbm_to_vmem [thread:$0]  %s1850_s10, 1024, %s1704_s26, [#allocation15], %s1515_s15, %s1515_s15, %s1516_s16  }
  0x86   :  { %1501 = dma.done.wait [#allocation3], 128  }
  0x87   :  { %1502 = vsyncadd [#allocation3], 4294967168 }
  0x88   :  { %1503 = dma.done.wait [#allocation6], 2048  }
  0x89   :  { %1504 = vsyncadd [#allocation6], 4294965248 }
  0x8a   :  { %1505 = dma.done.wait [#allocation9], 2048  }
  0x8b   :  { %1506 = vsyncadd [#allocation9], 4294965248 }
  0x8c   :  { %1507 = dma.done.wait [#allocation12], 2048  }
  0x8d   :  { %1508 = vsyncadd [#allocation12], 4294965248 }
  0x8e   :  { %1509 = dma.done.wait [#allocation15], 1024  }
  0x8f   :  { %1510 = vsyncadd [#allocation15], 4294966272  ;;  %v1523_v0 = vmov 0.0   ;;  %vm1524_vm0 = vmmov 0   ;;  %v1246_v1 = vld [vmem:[#allocation5] sm:$0xff]   ;;  %v1247_v2 = vld [vmem:[#allocation5 + $0x8] sm:$0xff]  }
  0x90   :  { %1091 = vmatprep.subr.bf16.mxu0 %v1523_v0  ;;  %1107 = vmatprep.mubr.msk.bf16.mxu0 %vm1524_vm0, %v1523_v0  ;;  %v1248_v3 = vld [vmem:[#allocation5 + $0x10] sm:$0xff]   ;;  %v1249_v4 = vld [vmem:[#allocation5 + $0x18] sm:$0xff]   ;;  %v1256_v5 = vld [vmem:[#allocation8] sm:$0xff]   ;;  %s1525_s27 = smov [#allocation16]  }
  0x91   :  { %1111 = vmatprep.subr.bf16.mxu1 %v1523_v0  ;;  %1127 = vmatprep.mubr.msk.bf16.mxu1 %vm1524_vm0, %v1523_v0  ;;  %v1258_v6 = vld [vmem:[#allocation8 + $0x8] sm:$0xff]   ;;  %v1250_v7 = vld [vmem:[#allocation5 + $0x20] sm:$0xff]   ;;  %v1260_v8 = vld [vmem:[#allocation8 + $0x10] sm:$0xff]  }
  0x92   :  { %1092 = vmatpush3.bf16.msra.mxu0 %v1246_v1  ;;  %1112 = vmatpush3.bf16.msra.mxu1 %v1256_v5  ;;  %v1251_v9 = vld [vmem:[#allocation5 + $0x28] sm:$0xff]   ;;  %v1262_v10 = vld [vmem:[#allocation8 + $0x18] sm:$0xff]   ;;  %v1252_v11 = vld [vmem:[#allocation5 + $0x30] sm:$0xff]  }
  0x93   :  { %1093 = vmatprep.subr.bf16.mxu0 %v1523_v0  ;;  %1113 = vmatprep.subr.bf16.mxu1 %v1523_v0  ;;  %v1264_v12 = vld [vmem:[#allocation8 + $0x20] sm:$0xff]   ;;  %v1253_v13 = vld [vmem:[#allocation5 + $0x38] sm:$0xff]   ;;  %v1266_v14 = vld [vmem:[#allocation8 + $0x28] sm:$0xff]  }
  0x94   :  { %v1758_v15 = vld [vmem:[#allocation2] sm:$0xff]   ;;  %v1255_v16 = vld [vmem:[#allocation7] sm:$0xff]   ;;  %v1257_v17 = vld [vmem:[#allocation7 + $0x8] sm:$0xff]  }
  0x95   :  { %v1259_v18 = vld [vmem:[#allocation7 + $0x10] sm:$0xff]   ;;  %v1261_v19 = vld [vmem:[#allocation7 + $0x18] sm:$0xff]   ;;  %v1263_v20 = vld [vmem:[#allocation7 + $0x20] sm:$0xff]  }
  0x96   :  { %1094 = vmatpush3.bf16.msra.mxu0 %v1247_v2  ;;  %1114 = vmatpush3.bf16.msra.mxu1 %v1258_v6  ;;  %v1265_v21 = vld [vmem:[#allocation7 + $0x28] sm:$0xff]   ;;  %v1267_v22 = vld [vmem:[#allocation7 + $0x30] sm:$0xff]   ;;  %v1269_v24 = vld [vmem:[#allocation7 + $0x38] sm:$0xff]  }
  0x97   :  { %1095 = vmatprep.subr.bf16.mxu0 %v1523_v0  ;;  %1115 = vmatprep.subr.bf16.mxu1 %v1523_v0  ;;  %v1268_v23 = vld [vmem:[#allocation8 + $0x30] sm:$0xff]   ;;  %v1270_v25 = vld [vmem:[#allocation8 + $0x38] sm:$0xff]   ;;  %v1272_v26 = vld [vmem:[#allocation10] sm:$0xff]  }
  0x98   :  { %v1274_v27 = vld [vmem:[#allocation10 + $0x8] sm:$0xff]   ;;  %v1276_v28 = vld [vmem:[#allocation10 + $0x10] sm:$0xff]   ;;  %v1278_v29 = vld [vmem:[#allocation10 + $0x18] sm:$0xff]  }
  0x99   :  { %v1280_v30 = vld [vmem:[#allocation10 + $0x20] sm:$0xff]   ;;  %v1282_v31 = vld [vmem:[#allocation10 + $0x28] sm:$0xff]   ;;  %v1284_v32 = vld [vmem:[#allocation10 + $0x30] sm:$0xff]  }
  0x9a   :  { %1096 = vmatpush3.bf16.msra.mxu0 %v1248_v3  ;;  %1116 = vmatpush3.bf16.msra.mxu1 %v1260_v8  ;;  %v1286_v33 = vld [vmem:[#allocation10 + $0x38] sm:$0xff]   ;;  %v1271_v45 = vld [vmem:[#allocation11] sm:$0xff]   ;;  %v1273_v47 = vld [vmem:[#allocation11 + $0x8] sm:$0xff]  }
  0x9b   :  { %1097 = vmatprep.subr.bf16.mxu0 %v1523_v0  ;;  %1117 = vmatprep.subr.bf16.mxu1 %v1523_v0  ;;  %v967_v34 = vld [vmem:[%s1842_s2] ss:$0 sm:$0xff]  ;;  %v1275_v48 = vld [vmem:[#allocation11 + $0x10] sm:$0xff]   ;;  %v1279_v50 = vld [vmem:[#allocation11 + $0x20] sm:$0xff]  }
  0x9c   :  { %v1277_v49 = vld [vmem:[#allocation11 + $0x18] sm:$0xff]   ;;  %v1281_v51 = vld [vmem:[#allocation11 + $0x28] sm:$0xff]   ;;  %v1283_v52 = vld [vmem:[#allocation11 + $0x30] sm:$0xff]  }
  0x9d   :  { %v1285_v53 = vld [vmem:[#allocation11 + $0x38] sm:$0xff]   ;;  %v1287_v54 = vld [vmem:[#allocation13] sm:$0xff]   ;;  %v1288_v55 = vld [vmem:[#allocation13 + $0x8] sm:$0xff]  }
  0x9e   :  { %1098 = vmatpush3.bf16.msra.mxu0 %v1249_v4  ;;  %1118 = vmatpush3.bf16.msra.mxu1 %v1262_v10  ;;  %v1289_v56 = vld [vmem:[#allocation13 + $0x10] sm:$0xff]   ;;  %v1290_v57 = vld [vmem:[#allocation13 + $0x18] sm:$0xff]   ;;  %v1291_v58 = vld [vmem:[#allocation13 + $0x20] sm:$0xff]  }
  0x9f   :  { %1099 = vmatprep.subr.bf16.mxu0 %v1523_v0  ;;  %1119 = vmatprep.subr.bf16.mxu1 %v1523_v0  ;;  %v1292_v63 = vld [vmem:[#allocation13 + $0x28] sm:$0xff]   ;;  %v1293_v1 = vld [vmem:[#allocation13 + $0x30] sm:$0xff]   ;;  %v1294_v2 = vld [vmem:[#allocation13 + $0x38] sm:$0xff]  }
  0xa0   :  { %v1295_v6 = vld [vmem:[#allocation14] sm:$0xff]   ;;  %v1296_v8 = vld [vmem:[#allocation14 + $0x8] sm:$0xff]   ;;  %v1298_v10 = vld [vmem:[#allocation14 + $0x18] sm:$0xff]  }
  0xa2   :  { %1100 = vmatpush3.bf16.msra.mxu0 %v1250_v7  ;;  %1120 = vmatpush3.bf16.msra.mxu1 %v1264_v12 }
  0xa3   :  { %1101 = vmatprep.subr.bf16.mxu0 %v1523_v0  ;;  %1121 = vmatprep.subr.bf16.mxu1 %v1523_v0 }
  0xa6   :  { %1102 = vmatpush3.bf16.msra.mxu0 %v1251_v9  ;;  %1122 = vmatpush3.bf16.msra.mxu1 %v1266_v14  ;;  %v1297_v9 = vld [vmem:[#allocation14 + $0x10] sm:$0xff]  }
  0xa7   :  { %1103 = vmatprep.subr.bf16.mxu0 %v1523_v0  ;;  %1123 = vmatprep.subr.bf16.mxu1 %v1523_v0 }
  0xaa   :  { %1104 = vmatpush3.bf16.msra.mxu0 %v1252_v11  ;;  %1124 = vmatpush3.bf16.msra.mxu1 %v1268_v23  ;;  %v1299_v11 = vld [vmem:[#allocation14 + $0x20] sm:$0xff]  }
  0xab   :  { %1105 = vmatprep.subr.bf16.mxu0 %v1523_v0  ;;  %1125 = vmatprep.subr.bf16.mxu1 %v1523_v0 }
  0xae   :  { %1106 = vmatpush3.bf16.msra.mxu0 %v1253_v13  ;;  %1126 = vmatpush3.bf16.msra.mxu1 %v1270_v25  ;;  %v993_v13 = vld [vmem:[%s1845_s5] ss:$0 sm:$0xff] }
  0xaf   :  { %1131 = vmatprep.subr.bf16.mxu0 %v1523_v0  ;;  %1151 = vmatprep.subr.bf16.mxu1 %v1523_v0 }
  0xb1   :  { %1108 = vmatmul.mubr.bf16.vlgmr.msra.gmra.mrb[0].mxu0 %v1758_v15 }
  0xb2   :  { %1132 = vmatpush3.bf16.msra.mxu0 %v1255_v16  ;;  %1147 = vmatprep.mubr.msk.bf16.mxu0 %vm1524_vm0, %v1523_v0 }
  0xb3   :  { %1133 = vmatprep.subr.bf16.mxu0 %v1523_v0 }
  0xb6   :  { %1134 = vmatpush3.bf16.msra.mxu0 %v1257_v17 }
  0xb7   :  { %1135 = vmatprep.subr.bf16.mxu0 %v1523_v0 }
  0xba   :  { %1136 = vmatpush3.bf16.msra.mxu0 %v1259_v18 }
  0xbb   :  { %1137 = vmatprep.subr.bf16.mxu0 %v1523_v0 }
  0xbe   :  { %1138 = vmatpush3.bf16.msra.mxu0 %v1261_v19 }
  0xbf   :  { %1139 = vmatprep.subr.bf16.mxu0 %v1523_v0 }
  0xc2   :  { %1140 = vmatpush3.bf16.msra.mxu0 %v1263_v20 }
  0xc3   :  { %1141 = vmatprep.subr.bf16.mxu0 %v1523_v0 }
  0xc6   :  { %1142 = vmatpush3.bf16.msra.mxu0 %v1265_v21 }
  0xc7   :  { %1143 = vmatprep.subr.bf16.mxu0 %v1523_v0 }
  0xca   :  { %1144 = vmatpush3.bf16.msra.mxu0 %v1267_v22 }
  0xcb   :  { %1145 = vmatprep.subr.bf16.mxu0 %v1523_v0 }
  0xce   :  { %1146 = vmatpush3.bf16.msra.mxu0 %v1269_v24 }
  0xcf   :  { %1171 = vmatprep.subr.bf16.mxu0 %v1523_v0 }
  0xd1   :  { %1148 = vmatmul.mubr.bf16.vlgmr.msra.gmra.mrb[4].mxu0 %v1758_v15 }
  0xd2   :  { %1187 = vmatprep.mubr.msk.bf16.mxu0 %vm1524_vm0, %v1523_v0  ;;  %1172 = vmatpush3.bf16.msra.mxu0 %v1272_v26 }
  0xd3   :  { %1173 = vmatprep.subr.bf16.mxu0 %v1523_v0 }
  0xd6   :  { %1174 = vmatpush3.bf16.msra.mxu0 %v1274_v27 }
  0xd7   :  { %1175 = vmatprep.subr.bf16.mxu0 %v1523_v0 }
  0xda   :  { %1176 = vmatpush3.bf16.msra.mxu0 %v1276_v28 }
  0xdb   :  { %1177 = vmatprep.subr.bf16.mxu0 %v1523_v0 }
  0xde   :  { %1178 = vmatpush3.bf16.msra.mxu0 %v1278_v29 }
  0xdf   :  { %1179 = vmatprep.subr.bf16.mxu0 %v1523_v0 }
  0xe2   :  { %1180 = vmatpush3.bf16.msra.mxu0 %v1280_v30 }
  0xe3   :  { %1181 = vmatprep.subr.bf16.mxu0 %v1523_v0 }
  0xe6   :  { %1182 = vmatpush3.bf16.msra.mxu0 %v1282_v31 }
  0xe7   :  { %1183 = vmatprep.subr.bf16.mxu0 %v1523_v0 }
  0xea   :  { %1184 = vmatpush3.bf16.msra.mxu0 %v1284_v32  ;;  %v1300_v32 = vld [vmem:[#allocation14 + $0x28] sm:$0xff]  }
  0xeb   :  { %1185 = vmatprep.subr.bf16.mxu0 %v1523_v0 }
  0xee   :  { %1186 = vmatpush3.bf16.msra.mxu0 %v1286_v33  ;;  %v1301_v33 = vld [vmem:[#allocation14 + $0x30] sm:$0xff]  }
  0xef   :  { %1211 = vmatprep.subr.bf16.mxu0 %v1523_v0 }
  0xf1   :  { %1188 = vmatmul.mubr.bf16.vlgmr.msra.gmra.mrb[8].mxu0 %v1758_v15 }
  0xf2   :  { %1227 = vmatprep.mubr.msk.bf16.mxu0 %vm1524_vm0, %v1523_v0  ;;  %1212 = vmatpush3.bf16.msra.mxu0 %v1295_v6 }
  0xf3   :  { %1213 = vmatprep.subr.bf16.mxu0 %v1523_v0 }
  0xf6   :  { %1214 = vmatpush3.bf16.msra.mxu0 %v1296_v8 }
  0xf7   :  { %1215 = vmatprep.subr.bf16.mxu0 %v1523_v0 }
  0xfa   :  { %1216 = vmatpush3.bf16.msra.mxu0 %v1297_v9 }
  0xfb   :  { %1217 = vmatprep.subr.bf16.mxu0 %v1523_v0 }
  0xfe   :  { %1218 = vmatpush3.bf16.msra.mxu0 %v1298_v10 }
  0xff   :  { %1219 = vmatprep.subr.bf16.mxu0 %v1523_v0 }
 0x102   :  { %1220 = vmatpush3.bf16.msra.mxu0 %v1299_v11 }
 0x103   :  { %1221 = vmatprep.subr.bf16.mxu0 %v1523_v0 }
 0x106   :  { %1222 = vmatpush3.bf16.msra.mxu0 %v1300_v32 }
 0x107   :  { %1223 = vmatprep.subr.bf16.mxu0 %v1523_v0 }
 0x10a   :  { %1224 = vmatpush3.bf16.msra.mxu0 %v1301_v33 }
 0x10b   :  { %1225 = vmatprep.subr.bf16.mxu0 %v1523_v0 }
 0x184   :  { %v265_v35 = vpop.f32.mrb[0].mxu0 }
 0x185   :  { %v266_v36 = vadd.f32 %v967_v34, %v265_v35  ;;  %v1109_v37 = vpop.f32.mrb[1].mxu0 }
 0x186   :  { %v268_v38 = vpop.f32.mrb[2].mxu0 }
 0x187   :  { %v272_v39 = vmul.f32 0.2, %v266_v36  ;;  %v269_v40 = vadd.f32 %v967_v34, %v268_v38  ;;  %v1110_v41 = vpop.f32.mrb[3].mxu0  ;;  %v1302_v34 = vld [vmem:[#allocation14 + $0x38] sm:$0xff]  }
 0x188   :  { %1226 = vmatpush3.bf16.msra.mxu0 %v1302_v34 }
 0x189   :  { %v273_v42 = vmul.f32 0.2, %v269_v40  ;;  %v274_v43 = vmax.f32 %v266_v36, %v272_v39  ;;  %v1018_v36 = vld [vmem:[%s1849_s9] ss:$0 sm:$0xff]  ;;  %s951_s9 = sshll.u32 %s1525_s27, 4  ;;  %s952_s9 = int_to_ptr.vmem [resolvable:$true] %s951_s9 }
 0x18a   :  { %s1479_s28 = scalar_lea.vmem %s952_s9, 256  ;;  %p1484_p9 = scmp.lt.s32.totalorder %s952_s9, %s952_s9 }
 0x18b   :  { %v275_v44 = vmax.f32 %v269_v40, %v273_v42  ;;  %p1480_p8 = scmp.ne.s32.totalorder %s952_s9, %s1479_s28  ;;  %p1485_p10 = scmp.lt.s32.totalorder %s1479_s28, %s1479_s28 }
 0x18d   :  { %v276_v46 = vpack.c.bf16 %v275_v44, %v274_v43  ;;  %p1486_p11 = por %p1485_p10, %p1484_p9 }
 0x18f   :  { %1128 = vmatmul.mubr.bf16.vlgmr.msra.gmra.mrb[0].mxu1 %v276_v46  ;;  %p1487_p12 = pnand %p1486_p11, %p1480_p8 }
 0x190   :  { %1152 = vmatpush3.bf16.msra.mxu1 %v1271_v45  ;;  %1167 = vmatprep.mubr.msk.bf16.mxu1 %vm1524_vm0, %v1523_v0 }
 0x191   :  { %1153 = vmatprep.subr.bf16.mxu1 %v1523_v0 }
 0x194   :  { %1154 = vmatpush3.bf16.msra.mxu1 %v1273_v47 }
 0x195   :  { %1155 = vmatprep.subr.bf16.mxu1 %v1523_v0 }
 0x198   :  { %1156 = vmatpush3.bf16.msra.mxu1 %v1275_v48 }
 0x199   :  { %1157 = vmatprep.subr.bf16.mxu1 %v1523_v0 }
 0x19c   :  { %1158 = vmatpush3.bf16.msra.mxu1 %v1277_v49 }
 0x19d   :  { %1159 = vmatprep.subr.bf16.mxu1 %v1523_v0 }
 0x1a0   :  { %1160 = vmatpush3.bf16.msra.mxu1 %v1279_v50 }
 0x1a1   :  { %1161 = vmatprep.subr.bf16.mxu1 %v1523_v0 }
 0x1a4   :  { %1162 = vmatpush3.bf16.msra.mxu1 %v1281_v51  ;;  %v480_v59 = vpop.f32.mrb[4].mxu0 }
 0x1a5   :  { %1163 = vmatprep.subr.bf16.mxu1 %v1523_v0  ;;  %v1149_v60 = vpop.f32.mrb[5].mxu0 }
 0x1a6   :  { %v483_v61 = vpop.f32.mrb[6].mxu0 }
 0x1a7   :  { %v1150_v62 = vpop.f32.mrb[7].mxu0 }
 0x1a8   :  { %1164 = vmatpush3.bf16.msra.mxu1 %v1283_v52 }
 0x1a9   :  { %1165 = vmatprep.subr.bf16.mxu1 %v1523_v0 }
 0x1ac   :  { %1166 = vmatpush3.bf16.msra.mxu1 %v1285_v53 }
 0x1ad   :  { %1191 = vmatprep.subr.bf16.mxu1 %v1523_v0 }
 0x1af   :  { %1168 = vmatmul.mubr.bf16.vlgmr.msra.gmra.mrb[4].mxu1 %v276_v46 }
 0x1b0   :  { %1192 = vmatpush3.bf16.msra.mxu1 %v1287_v54  ;;  %1207 = vmatprep.mubr.msk.bf16.mxu1 %vm1524_vm0, %v1523_v0 }
 0x1b1   :  { %1193 = vmatprep.subr.bf16.mxu1 %v1523_v0 }
 0x1b4   :  { %1194 = vmatpush3.bf16.msra.mxu1 %v1288_v55 }
 0x1b5   :  { %1195 = vmatprep.subr.bf16.mxu1 %v1523_v0 }
 0x1b8   :  { %1196 = vmatpush3.bf16.msra.mxu1 %v1289_v56 }
 0x1b9   :  { %1197 = vmatprep.subr.bf16.mxu1 %v1523_v0 }
 0x1bc   :  { %1198 = vmatpush3.bf16.msra.mxu1 %v1290_v57 }
 0x1bd   :  { %1199 = vmatprep.subr.bf16.mxu1 %v1523_v0 }
 0x1c0   :  { %1200 = vmatpush3.bf16.msra.mxu1 %v1291_v58 }
 0x1c1   :  { %1201 = vmatprep.subr.bf16.mxu1 %v1523_v0 }
 0x1c4   :  { %1202 = vmatpush3.bf16.msra.mxu1 %v1292_v63  ;;  %v704_v3 = vpop.f32.mrb[8].mxu0 }
 0x1c5   :  { %1203 = vmatprep.subr.bf16.mxu1 %v1523_v0  ;;  %v1189_v4 = vpop.f32.mrb[9].mxu0 }
 0x1c6   :  { %v707_v5 = vpop.f32.mrb[10].mxu0 }
 0x1c7   :  { %v1190_v7 = vpop.f32.mrb[11].mxu0 }
 0x1c8   :  { %1204 = vmatpush3.bf16.msra.mxu1 %v1293_v1 }
 0x1c9   :  { %1205 = vmatprep.subr.bf16.mxu1 %v1523_v0  ;;  %v1019_v0 = vld [vmem:[%s1851_s11] ss:$0 sm:$0xff] }
 0x1cc   :  { %1206 = vmatpush3.bf16.msra.mxu1 %v1294_v2 }
 0x262   :  { %v391_v12 = vpop.f32.mrb[0].mxu1 }
 0x263   :  { %v481_v14 = vadd.f32 %v480_v59, %v391_v12  ;;  %v1129_v15 = vpop.f32.mrb[1].mxu1 }
 0x264   :  { %v394_v16 = vpop.f32.mrb[2].mxu1 }
 0x265   :  { %v494_v17 = vadd.f32 %v993_v13, %v481_v14  ;;  %v484_v18 = vadd.f32 %v483_v61, %v394_v16  ;;  %v1130_v19 = vpop.f32.mrb[3].mxu1 }
 0x267   :  { %v496_v20 = vmul.f32 0.2, %v494_v17  ;;  %v495_v21 = vadd.f32 %v993_v13, %v484_v18 }
 0x269   :  { %v497_v22 = vmul.f32 0.2, %v495_v21  ;;  %v498_v23 = vmax.f32 %v494_v17, %v496_v20 }
 0x26b   :  { %v499_v24 = vmax.f32 %v495_v21, %v497_v22 }
 0x26d   :  { %v500_v25 = vpack.c.bf16 %v499_v24, %v498_v23 }
 0x26f   :  { %1208 = vmatmul.mubr.bf16.vlgmr.msra.gmra.mrb[8].mxu1 %v500_v25 }
 0x282   :  { %v615_v26 = vpop.f32.mrb[4].mxu1 }
 0x283   :  { %v705_v27 = vadd.f32 %v704_v3, %v615_v26  ;;  %v1169_v28 = vpop.f32.mrb[5].mxu1 }
 0x284   :  { %v618_v29 = vpop.f32.mrb[6].mxu1 }
 0x285   :  { %v708_v30 = vadd.f32 %v707_v5, %v618_v29  ;;  %v1170_v31 = vpop.f32.mrb[7].mxu1 }
 0x342   :  { %v809_v35 = vpop.f32.mrb[8].mxu1 }
 0x343   :  { %v816_v37 = vadd.f32 %v809_v35, %v705_v27  ;;  %v1209_v38 = vpop.f32.mrb[9].mxu1 }
 0x344   :  { %v812_v39 = vpop.f32.mrb[10].mxu1 }
 0x345   :  { %v825_v40 = vadd.f32 %v1018_v36, %v816_v37  ;;  %v817_v41 = vadd.f32 %v812_v39, %v708_v30  ;;  %v1210_v42 = vpop.f32.mrb[11].mxu1 }
 0x347   :  { %v827_v43 = vmul.f32 0.2, %v825_v40  ;;  %v826_v44 = vadd.f32 %v1018_v36, %v817_v41 }
 0x349   :  { %v828_v45 = vmul.f32 0.2, %v826_v44  ;;  %v829_v46 = vmax.f32 %v825_v40, %v827_v43 }
 0x34b   :  { %v830_v47 = vmax.f32 %v826_v44, %v828_v45 }
 0x34d   :  { %v831_v48 = vpack.c.bf16 %v830_v47, %v829_v46 }
 0x34f   :  { %1228 = vmatmul.mubr.bf16.vlgmr.msra.gmra.mrb[12].mxu0 %v831_v48 }
 0x422   :  { %v937_v49 = vpop.f32.mrb[12].mxu0 }
 0x423   :  { %v938_v50 = vadd.f32 %v1019_v0, %v937_v49  ;;  %v1229_v51 = vpop.f32.mrb[13].mxu0 }
 0x424   :  { %v940_v52 = vpop.f32.mrb[14].mxu0 }
 0x425   :  { %944 = vst [vmem:[#allocation16] sm:$0xff] %v938_v50  ;;  %v941_v53 = vadd.f32 %v1019_v0, %v940_v52  ;;  %v1230_v54 = vpop.f32.mrb[15].mxu0 }
 0x427   :  { %945 = vst [vmem:[#allocation16 + $0x8] sm:$0xff] %v941_v53 }
 0x428   :  { %1490 = shalt.err (!%p1487_p12)
}
 0x429   :  { %s1491_s0 = scalar_lea.hbm %s1852_s12, 256 }
 0x42a   :  { %p1492_p13 = scmp.ne.s32.totalorder %s1852_s12, %s1491_s0  ;;  %p1495_p0 = scmp.lt.u32.totalorder %s1491_s0, %s1852_s12 }
 0x42c   :  { %p1497_p1 = pnand %p1495_p0, %p1492_p13 }
 0x42e   :  { %1500 = shalt.err (!%p1497_p1)
}
 0x42f   :  { %s1526_s23 = smov 128   ;;  %s1527_s13 = smov 8  }
 0x430   :  { %957 = dma.vmem_to_hbm [thread:$0]  %s952_s9, 256, %s1852_s12, [#allocation4], %s1526_s23, %s1526_s23, %s1527_s13  }
 0x431   :  { %1511 = dma.done.wait [#allocation4], 256  }
 0x432   :  { %1512 = vsyncadd [#allocation4], 4294967040 }
 0x433   :  { %961 = vsyncpa [#allocation3], 1 }
 0x434   :  { %962 = vsyncpa [#allocation6], 1 }
 0x435   :  { %963 = vsyncpa [#allocation9], 1 }
 0x436   :  { %964 = vsyncpa [#allocation12], 1 }
 0x437   :  { %965 = vsyncpa [#allocation15], 1 }
 0x438   :  { %966 = vsyncpa [#allocation4], 1 }

</bundles_post_ra>
